<compile_context>
chip_gen: v6e
topology: v6e:2x2x1
jax: 0.10.0
libtpu: 0.0.40
codegen_flags: <defaults>
</compile_context>

<pallas_src>
import functools

import jax
import jax.numpy as jnp
from jax import lax
from jax.experimental import pallas as pl
from jax.experimental.pallas import tpu as pltpu


_LANES = 128
_NEG_BIG = -1e30          # finite "-inf" for masked vocab columns (avoids NaNs)


def _round_up(x, m):
    return ((x + m - 1) // m) * m


def _choose_tn(V, target):
    """Pick vocab tile width (multiple of 128) and the padded vocab size."""
    target = max(_LANES, _round_up(int(target), _LANES))
    v128 = _round_up(V, _LANES)
    if v128 <= target:
        return v128, v128                      # single vocab tile
    best = None
    for cand in range(target, _LANES - 1, -_LANES):
        if v128 % cand == 0:
            best = cand
            break
    if best is not None and 2 * best > target:  # a divisor close to target exists
        return best, v128
    # otherwise pad V up to a multiple of `target` to keep wide MXU tiles
    return target, _round_up(V, target)


def _vmem_budget():
    """~80% of physical VMEM: ~102 MiB on v5e/v6e (128 MiB), ~51 MiB on v7x (64 MiB)."""
    cap = 64 << 20
    try:
        info = pltpu.get_tpu_info()
        cap = int(getattr(info, "vmem_capacity_bytes", cap))
    except Exception:
        pass
    return max(32 << 20, int(cap * 0.80))


def _vmem_estimate(tm, tn, hs, ht, in_bytes):
    blocks = 2 * (tm * (hs + ht) * in_bytes        # double-buffered input row chunks
                  + (hs + ht) * tn * in_bytes      # double-buffered weight tiles
                  + 2 * tn * 4                     # bias tiles (f32)
                  + tm * _LANES * 4                # labels block (lane-padded (TM,1))
                  + 2 * tm * _LANES * 4)           # hard/soft out blocks (lane-padded)
    scratch = 6 * tm * _LANES * 4                  # (TM,128) lane accumulators
    interm = 4 * tm * tn * 4                       # f32 s/t logits + exp/select temps
    return blocks + scratch + interm + (2 << 20)   # compiler headroom


def _distill_kernel(s_in_ref, s_w_ref, t_in_ref, t_w_ref, lab_ref, s_b_ref, t_b_ref,
                    hard_ref, soft_ref,
                    m_sc, l_sc, lbl_sc, dot_sc, ss_sc, tt_sc,
                    *, ignore_index, beta, tm, tn, v_actual, bt_actual, mask_cols):
    i = pl.program_id(0)          # row-chunk axis ("parallel")
    j = pl.program_id(1)          # vocab-tile axis ("arbitrary" / reduction)
    nj = pl.num_programs(1)
    n_slab = tn // _LANES

    @pl.when(j == 0)
    def _init():
        zeros = jnp.zeros((tm, _LANES), jnp.float32)
        m_sc[...] = jnp.full((tm, _LANES), -jnp.inf, jnp.float32)
        l_sc[...] = zeros
        lbl_sc[...] = zeros
        dot_sc[...] = zeros
        ss_sc[...] = zeros
        tt_sc[...] = zeros

    # Logits tile (TM, TN); weights already (H, V) -> plain (M,K)x(K,N) on the MXU.
    s_logits = jnp.dot(s_in_ref[...], s_w_ref[...],
                       preferred_element_type=jnp.float32) + s_b_ref[...]
    t_logits = jnp.dot(t_in_ref[...], t_w_ref[...],
                       preferred_element_type=jnp.float32) + t_b_ref[...]

    labels = lab_ref[...]                                    # (TM, 1) int32
    lane = lax.broadcasted_iota(jnp.int32, (1, _LANES), 1)   # hoisted, reused below
    base = j * tn

    # ---- slice the tile into 128-wide lane slabs (vreg-aligned static slices) ---
    s_slabs, s_slabs_ce, t_slabs = [], [], []
    for c in range(n_slab):
        sl = slice(c * _LANES, (c + 1) * _LANES)
        s_c = s_logits[:, sl]
        t_c = t_logits[:, sl]
        if mask_cols:
            # padded vocab columns: logits are exactly 0 (zero-padded W/bias) so the
            # cosine sums need no mask; only the CE path must see "-inf".
            valid = lane < (v_actual - (base + c * _LANES))
            s_ce = jnp.where(valid, s_c, _NEG_BIG)
        else:
            s_ce = s_c
        s_slabs.append(s_c)
        s_slabs_ce.append(s_ce)
        t_slabs.append(t_c)

    # ---- hard (CE) loss: per-lane online logsumexp (VALU/EUP only, no XLU) ------
    m_old = m_sc[...]
    tile_max = s_slabs_ce[0]
    for c in range(1, n_slab):
        tile_max = jnp.maximum(tile_max, s_slabs_ce[c])
    m_new = jnp.maximum(m_old, tile_max)
    l_new = l_sc[...] * jnp.exp(m_old - m_new)
    for c in range(n_slab):
        l_new = l_new + jnp.exp(s_slabs_ce[c] - m_new)
    m_sc[...] = m_new
    l_sc[...] = l_new

    # ---- per-lane label-logit gather + cosine accumulators (VALU only) ----------
    lbl_acc = lbl_sc[...]
    dot_acc = dot_sc[...]
    ss_acc = ss_sc[...]
    tt_acc = tt_sc[...]
    for c in range(n_slab):
        s_c, t_c = s_slabs[c], t_slabs[c]
        match = lane == (labels - (base + c * _LANES))   # j-shifted labels vs local iota
        lbl_acc = lbl_acc + jnp.where(match, s_c, 0.0)
        dot_acc = dot_acc + s_c * t_c
        ss_acc = ss_acc + s_c * s_c
        tt_acc = tt_acc + t_c * t_c
    lbl_sc[...] = lbl_acc
    dot_sc[...] = dot_acc
    ss_sc[...] = ss_acc
    tt_sc[...] = tt_acc

    # ---- finalize: single cross-lane (XLU) reduce per row chunk -----------------
    @pl.when(j == nj - 1)
    def _fin():
        m_lane = m_sc[...]
        m_row = jnp.max(m_lane, axis=-1, keepdims=True)                    # (TM,1)
        l_row = jnp.sum(l_sc[...] * jnp.exp(m_lane - m_row),
                        axis=-1, keepdims=True)
        lse = m_row + jnp.log(l_row)
        lbl_row = jnp.sum(lbl_sc[...], axis=-1, keepdims=True)
        valid_lbl = labels != ignore_index
        hard_ref[...] = jnp.where(valid_lbl, lse - lbl_row, 0.0)

        row = i * tm + lax.broadcasted_iota(jnp.int32, (tm, 1), 0)
        valid_row = row < bt_actual                                        # padded rows
        dot_row = jnp.sum(dot_sc[...], axis=-1, keepdims=True)
        ss_row = jnp.sum(ss_sc[...], axis=-1, keepdims=True)
        tt_row = jnp.sum(tt_sc[...], axis=-1, keepdims=True)
        # cosine is scale-invariant -> temperature / double normalization drop out
        cos = (dot_row * lax.rsqrt(jnp.maximum(ss_row, 1e-24))
               * lax.rsqrt(jnp.maximum(tt_row, 1e-24)))
        soft_ref[...] = jnp.where(valid_row, beta * (1.0 - cos), 0.0)


def fused_linear_cosine_loss(student_input, student_weight, teacher_input, teacher_weight,
                             true_labels, student_bias=None, teacher_bias=None, *,
                             weight_hard_loss=0.5, weight_soft_loss=0.5, beta=0.5,
                             ignore_index=-100, temperature=1.0,
                             block_rows=1024, block_cols=1024, matmul_dtype=None):
    assert temperature != 0.0, "Temperature cannot be 0."
    # cosine similarity is scale-invariant -> temperature cancels inside the kernel;
    # the argument is kept for API parity with the torch module.

    BT, Hs = student_input.shape
    _, Ht = teacher_input.shape
    V = student_weight.shape[0]
    assert teacher_weight.shape[0] == V

    # bf16 MXU operands (f32 accumulation) by default when inputs are f32:
    # full MXU rate and half the streamed weight bytes on all generations.
    if matmul_dtype is None:
        in_dtype = jnp.bfloat16 if student_input.dtype == jnp.float32 else student_input.dtype
    else:
        in_dtype = jnp.dtype(matmul_dtype)
    in_bytes = jnp.dtype(in_dtype).itemsize

    # ---- tile selection ---------------------------------------------------------
    bt8 = _round_up(BT, 8)
    TM = min(_round_up(block_rows, 8), bt8)
    # keep >= 2 row chunks so the "parallel" axis can split across v7x's two TCs
    if bt8 >= 16 and TM >= bt8:
        TM = _round_up((bt8 + 1) // 2, 8)
    TN, V_pad = _choose_tn(V, block_cols)

    budget = _vmem_budget()
    while _vmem_estimate(TM, TN, Hs, Ht, in_bytes) > budget:
        if TM > 512:
            TM = _round_up(TM // 2, 8)
        elif TN > 512:
            TN, V_pad = _choose_tn(V, TN // 2)
        elif TM > 256:
            TM = _round_up(TM // 2, 8)
        elif TN > 256:
            TN, V_pad = _choose_tn(V, TN // 2)
        elif TM > 8:
            TM = max(8, _round_up(TM // 2, 8))
        elif TN > _LANES:
            TN, V_pad = _choose_tn(V, TN // 2)
        else:
            break

    BT_pad = _round_up(bt8, TM)
    n_row = BT_pad // TM
    n_col = V_pad // TN
    mask_cols = V_pad != V

    # ---- operand preparation ------------------------------------------------------
    s_in = student_input.astype(in_dtype)
    t_in = teacher_input.astype(in_dtype)
    if BT_pad != BT:
        s_in = jnp.pad(s_in, ((0, BT_pad - BT), (0, 0)))
        t_in = jnp.pad(t_in, ((0, BT_pad - BT), (0, 0)))

    # Pre-transpose once: MXU-native (K, N) weight layout. Zero-pad the vocab so
    # padded columns yield exactly-0 logits (CE path masks them in-kernel).
    s_w = student_weight.T.astype(in_dtype)          # (Hs, V)
    t_w = teacher_weight.T.astype(in_dtype)          # (Ht, V)
    s_b = (jnp.zeros((V,), jnp.float32) if student_bias is None
           else student_bias.astype(jnp.float32))
    t_b = (jnp.zeros((V,), jnp.float32) if teacher_bias is None
           else teacher_bias.astype(jnp.float32))
    if V_pad != V:
        s_w = jnp.pad(s_w, ((0, 0), (0, V_pad - V)))
        t_w = jnp.pad(t_w, ((0, 0), (0, V_pad - V)))
        s_b = jnp.pad(s_b, (0, V_pad - V))
        t_b = jnp.pad(t_b, (0, V_pad - V))
    s_b = s_b.reshape(1, V_pad)
    t_b = t_b.reshape(1, V_pad)

    labels = true_labels.astype(jnp.int32).reshape(BT, 1)
    if BT_pad != BT:
        labels = jnp.pad(labels, ((0, BT_pad - BT), (0, 0)),
                         constant_values=ignore_index)

    kernel = functools.partial(
        _distill_kernel, ignore_index=int(ignore_index), beta=float(beta),
        tm=TM, tn=TN, v_actual=V, bt_actual=BT, mask_cols=mask_cols)

    est = _vmem_estimate(TM, TN, Hs, Ht, in_bytes)
    vmem_limit = int(min(max(est, 32 << 20), budget))

    hard_rows, soft_rows = pl.pallas_call(
        kernel,
        out_shape=(jax.ShapeDtypeStruct((BT_pad, 1), jnp.float32),
                   jax.ShapeDtypeStruct((BT_pad, 1), jnp.float32)),
        grid_spec=pltpu.PrefetchScalarGridSpec(
            num_scalar_prefetch=0,
            grid=(n_row, n_col),
            in_specs=[
                pl.BlockSpec((TM, Hs), lambda i, j: (i, 0)),   # student rows
                pl.BlockSpec((Hs, TN), lambda i, j: (0, j)),   # student W^T tile
                pl.BlockSpec((TM, Ht), lambda i, j: (i, 0)),   # teacher rows
                pl.BlockSpec((Ht, TN), lambda i, j: (0, j)),   # teacher W^T tile
                pl.BlockSpec((TM, 1), lambda i, j: (i, 0)),    # labels
                pl.BlockSpec((1, TN), lambda i, j: (0, j)),    # student bias tile
                pl.BlockSpec((1, TN), lambda i, j: (0, j)),    # teacher bias tile
            ],
            out_specs=(pl.BlockSpec((TM, 1), lambda i, j: (i, 0)),
                       pl.BlockSpec((TM, 1), lambda i, j: (i, 0))),
            scratch_shapes=[pltpu.VMEM((TM, _LANES), jnp.float32) for _ in range(6)],
        ),
        compiler_params=pltpu.CompilerParams(
            dimension_semantics=("parallel", "arbitrary"),
            vmem_limit_bytes=vmem_limit),
    )(s_in, s_w, t_in, t_w, labels, s_b, t_b)

    hard_loss = jnp.sum(hard_rows) / BT
    soft_loss = jnp.sum(soft_rows) / BT
    return weight_hard_loss * hard_loss + weight_soft_loss * soft_loss


def _reference(student_input, student_weight, teacher_input, teacher_weight,
               true_labels, student_bias, teacher_bias, *,
               weight_hard_loss, weight_soft_loss, beta, ignore_index, temperature):
    BT = student_input.shape[0]
    s_logits = (student_input @ student_weight.T + student_bias).astype(jnp.float32)
    t_logits = (teacher_input @ teacher_weight.T + teacher_bias).astype(jnp.float32)
    log_probs = jax.nn.log_softmax(s_logits, axis=-1)
    valid = true_labels != ignore_index
    safe = jnp.where(valid, true_labels, 0)
    nll = -jnp.take_along_axis(log_probs, safe[:, None], axis=-1)[:, 0]
    hard = jnp.sum(jnp.where(valid, nll, 0.0)) / BT
    s_t, t_t = s_logits / temperature, t_logits / temperature
    s_n = s_t / jnp.maximum(jnp.linalg.norm(s_t, axis=-1, keepdims=True), 1e-12)
    t_n = t_t / jnp.maximum(jnp.linalg.norm(t_t, axis=-1, keepdims=True), 1e-12)
    cos = jnp.sum(s_n * t_n, -1) / jnp.maximum(
        jnp.linalg.norm(s_n, axis=-1) * jnp.linalg.norm(t_n, axis=-1), 1e-8)
    soft = jnp.sum(beta * (1.0 - cos)) / BT
    return weight_hard_loss * hard + weight_soft_loss * soft


if __name__ == "__main__":
    batch, seq = 2, 7
    BT = batch * seq                      # 14 -> exercises row padding/masking
    Hs, Ht = 32, 32

    key = jax.random.PRNGKey(0)
    k = jax.random.split(key, 7)

    def make_case(V):
        student_input = jax.random.normal(k[0], (BT, Hs), jnp.float32)
        teacher_input = jax.random.normal(k[1], (BT, Ht), jnp.float32)
        student_weight = jax.random.normal(k[2], (V, Hs), jnp.float32) * 0.02
        teacher_weight = jax.random.normal(k[3], (V, Ht), jnp.float32) * 0.02
        student_bias = jax.random.normal(k[4], (V,), jnp.float32) * 0.01
        teacher_bias = jax.random.normal(k[5], (V,), jnp.float32) * 0.01
        labels = jax.random.randint(k[6], (BT,), 0, V, jnp.int32)
        labels = labels.at[0].set(-100).at[5].set(-100)     # exercise ignore_index
        return (student_input, student_weight, teacher_input, teacher_weight,
                labels, student_bias, teacher_bias)

    cfg = dict(weight_hard_loss=0.5, weight_soft_loss=0.5, beta=0.5,
               ignore_index=-100, temperature=2.0)

    # --- V=256: 2 row chunks x 2 vocab tiles, exact f32 MXU operands (tight) ----
    args = make_case(256)
    ref = _reference(*args, **cfg)
    loss32 = fused_linear_cosine_loss(*args, block_rows=8, block_cols=128,
                                      matmul_dtype=jnp.float32, **cfg)
    loss32 = jax.block_until_ready(loss32)
    assert jnp.allclose(loss32, ref, rtol=1e-4, atol=1e-4), (loss32, ref)

    # --- default config: auto tiles + bf16 MXU operands (production path) -------
    loss16 = fused_linear_cosine_loss(*args, **cfg)
    loss16 = jax.block_until_ready(loss16)
    assert jnp.allclose(loss16, ref, rtol=2e-2, atol=2e-2), (loss16, ref)

    # --- V=300 (not a multiple of 128): vocab padding + in-kernel column mask ---
    args300 = make_case(300)
    ref300 = _reference(*args300, **cfg)
    loss300 = fused_linear_cosine_loss(*args300, block_rows=8, block_cols=128,
                                       matmul_dtype=jnp.float32, **cfg)
    loss300 = jax.block_until_ready(loss300)
    assert jnp.allclose(loss300, ref300, rtol=1e-4, atol=1e-4), (loss300, ref300)

    print("KERNEL_OK")
</pallas_src>

<mosaic_0001>
module attributes {stable_mosaic.version = 11 : i64} {
  func.func @_distill_kernel(%arg0: i32, %arg1: i32, %arg2: memref<8x32xf32, #tpu.memory_space<vmem>>, %arg3: memref<32x128xf32, #tpu.memory_space<vmem>>, %arg4: memref<8x32xf32, #tpu.memory_space<vmem>>, %arg5: memref<32x128xf32, #tpu.memory_space<vmem>>, %arg6: memref<8x1xi32, #tpu.memory_space<vmem>>, %arg7: memref<1x128xf32, #tpu.memory_space<vmem>>, %arg8: memref<1x128xf32, #tpu.memory_space<vmem>>, %arg9: memref<8x1xf32, #tpu.memory_space<vmem>>, %arg10: memref<8x1xf32, #tpu.memory_space<vmem>>, %arg11: memref<8x128xf32, #tpu.memory_space<vmem>>, %arg12: memref<8x128xf32, #tpu.memory_space<vmem>>, %arg13: memref<8x128xf32, #tpu.memory_space<vmem>>, %arg14: memref<8x128xf32, #tpu.memory_space<vmem>>, %arg15: memref<8x128xf32, #tpu.memory_space<vmem>>, %arg16: memref<8x128xf32, #tpu.memory_space<vmem>>) attributes {dimension_semantics = [#tpu.dimension_semantics<parallel>, #tpu.dimension_semantics<arbitrary>], iteration_bounds = array<i64: 2, 2>, scalar_prefetch = 0 : i64, scratch_operands = 6 : i64, tpu.core_type = #tpu.core_type<tc>, window_params = [{transform_indices = @transform_0, window_bounds = array<i64: 8, 32>}, {transform_indices = @transform_1, window_bounds = array<i64: 32, 128>}, {transform_indices = @transform_2, window_bounds = array<i64: 8, 32>}, {transform_indices = @transform_3, window_bounds = array<i64: 32, 128>}, {transform_indices = @transform_4, window_bounds = array<i64: 8, 1>}, {transform_indices = @transform_5, window_bounds = array<i64: 1, 128>}, {transform_indices = @transform_6, window_bounds = array<i64: 1, 128>}, {transform_indices = @transform_7, window_bounds = array<i64: 8, 1>}, {transform_indices = @transform_8, window_bounds = array<i64: 8, 1>}]} {
    %c0_i32 = arith.constant 0 : i32
    %0 = arith.cmpi eq, %arg1, %c0_i32 : i32
    %1 = arith.extui %0 : i1 to i32
    %c0_i32_0 = arith.constant 0 : i32
    %2 = arith.cmpi ne, %1, %c0_i32_0 : i32
    scf.if %2 {
      %cst_42 = arith.constant 0.000000e+00 : f32
      %55 = vector.broadcast %cst_42 : f32 to vector<8x128xf32>
      %cst_43 = arith.constant 0xFF800000 : f32
      %56 = vector.broadcast %cst_43 : f32 to vector<8x128xf32>
      %c0_44 = arith.constant 0 : index
      %c0_45 = arith.constant 0 : index
      %57 = vector.load %arg11[%c0_44, %c0_45] : memref<8x128xf32, #tpu.memory_space<vmem>>, vector<8x128xf32>
      tpu.vector_store %arg11[%c0_44, %c0_45], %56 {strides = array<i32>} : memref<8x128xf32, #tpu.memory_space<vmem>>, vector<8x128xf32>,
      %c0_46 = arith.constant 0 : index
      %c0_47 = arith.constant 0 : index
      %58 = vector.load %arg12[%c0_46, %c0_47] : memref<8x128xf32, #tpu.memory_space<vmem>>, vector<8x128xf32>
      tpu.vector_store %arg12[%c0_46, %c0_47], %55 {strides = array<i32>} : memref<8x128xf32, #tpu.memory_space<vmem>>, vector<8x128xf32>,
      %c0_48 = arith.constant 0 : index
      %c0_49 = arith.constant 0 : index
      %59 = vector.load %arg13[%c0_48, %c0_49] : memref<8x128xf32, #tpu.memory_space<vmem>>, vector<8x128xf32>
      tpu.vector_store %arg13[%c0_48, %c0_49], %55 {strides = array<i32>} : memref<8x128xf32, #tpu.memory_space<vmem>>, vector<8x128xf32>,
      %c0_50 = arith.constant 0 : index
      %c0_51 = arith.constant 0 : index
      %60 = vector.load %arg14[%c0_50, %c0_51] : memref<8x128xf32, #tpu.memory_space<vmem>>, vector<8x128xf32>
      tpu.vector_store %arg14[%c0_50, %c0_51], %55 {strides = array<i32>} : memref<8x128xf32, #tpu.memory_space<vmem>>, vector<8x128xf32>,
      %c0_52 = arith.constant 0 : index
      %c0_53 = arith.constant 0 : index
      %61 = vector.load %arg15[%c0_52, %c0_53] : memref<8x128xf32, #tpu.memory_space<vmem>>, vector<8x128xf32>
      tpu.vector_store %arg15[%c0_52, %c0_53], %55 {strides = array<i32>} : memref<8x128xf32, #tpu.memory_space<vmem>>, vector<8x128xf32>,
      %c0_54 = arith.constant 0 : index
      %c0_55 = arith.constant 0 : index
      %62 = vector.load %arg16[%c0_54, %c0_55] : memref<8x128xf32, #tpu.memory_space<vmem>>, vector<8x128xf32>
      tpu.vector_store %arg16[%c0_54, %c0_55], %55 {strides = array<i32>} : memref<8x128xf32, #tpu.memory_space<vmem>>, vector<8x128xf32>,
    } else {
    }
    %c0 = arith.constant 0 : index
    %c0_1 = arith.constant 0 : index
    %3 = vector.load %arg2[%c0, %c0_1] : memref<8x32xf32, #tpu.memory_space<vmem>>, vector<8x32xf32>
    %c0_2 = arith.constant 0 : index
    %c0_3 = arith.constant 0 : index
    %4 = vector.load %arg3[%c0_2, %c0_3] : memref<32x128xf32, #tpu.memory_space<vmem>>, vector<32x128xf32>
    %cst = arith.constant dense<0.000000e+00> : vector<8x128xf32>
    %5 = tpu.matmul %3, %4, %cst {dimension_numbers = #tpu.dot_dimension_numbers<[1], [0], [0], [1], [0, 0, 1, 1], [], []>} : vector<8x32xf32>, vector<32x128xf32>, vector<8x128xf32> -> vector<8x128xf32>
    %c0_4 = arith.constant 0 : index
    %c0_5 = arith.constant 0 : index
    %6 = vector.load %arg7[%c0_4, %c0_5] : memref<1x128xf32, #tpu.memory_space<vmem>>, vector<1x128xf32>
    %7 = vector.broadcast %6 : vector<1x128xf32> to vector<8x128xf32>
    %8 = arith.addf %5, %7 : vector<8x128xf32>
    %c0_6 = arith.constant 0 : index
    %c0_7 = arith.constant 0 : index
    %9 = vector.load %arg4[%c0_6, %c0_7] : memref<8x32xf32, #tpu.memory_space<vmem>>, vector<8x32xf32>
    %c0_8 = arith.constant 0 : index
    %c0_9 = arith.constant 0 : index
    %10 = vector.load %arg5[%c0_8, %c0_9] : memref<32x128xf32, #tpu.memory_space<vmem>>, vector<32x128xf32>
    %cst_10 = arith.constant dense<0.000000e+00> : vector<8x128xf32>
    %11 = tpu.matmul %9, %10, %cst_10 {dimension_numbers = #tpu.dot_dimension_numbers<[1], [0], [0], [1], [0, 0, 1, 1], [], []>} : vector<8x32xf32>, vector<32x128xf32>, vector<8x128xf32> -> vector<8x128xf32>
    %c0_11 = arith.constant 0 : index
    %c0_12 = arith.constant 0 : index
    %12 = vector.load %arg8[%c0_11, %c0_12] : memref<1x128xf32, #tpu.memory_space<vmem>>, vector<1x128xf32>
    %13 = vector.broadcast %12 : vector<1x128xf32> to vector<8x128xf32>
    %14 = arith.addf %11, %13 : vector<8x128xf32>
    %c0_13 = arith.constant 0 : index
    %c0_14 = arith.constant 0 : index
    %15 = vector.load %arg6[%c0_13, %c0_14] : memref<8x1xi32, #tpu.memory_space<vmem>>, vector<8x1xi32>
    %16 = tpu.iota {dimensions = array<i32: 1>} : vector<1x128xi32>
    %c128_i32 = arith.constant 128 : i32
    %17 = arith.muli %arg1, %c128_i32 : i32
    %c0_15 = arith.constant 0 : index
    %c0_16 = arith.constant 0 : index
    %18 = vector.load %arg11[%c0_15, %c0_16] : memref<8x128xf32, #tpu.memory_space<vmem>>, vector<8x128xf32>
    %19 = arith.maximumf %18, %8 : vector<8x128xf32>
    %c0_17 = arith.constant 0 : index
    %c0_18 = arith.constant 0 : index
    %20 = vector.load %arg12[%c0_17, %c0_18] : memref<8x128xf32, #tpu.memory_space<vmem>>, vector<8x128xf32>
    %21 = arith.subf %18, %19 : vector<8x128xf32>
    %22 = math.exp %21 : vector<8x128xf32>
    %23 = arith.mulf %20, %22 : vector<8x128xf32>
    %24 = arith.subf %8, %19 : vector<8x128xf32>
    %25 = math.exp %24 : vector<8x128xf32>
    %26 = arith.addf %23, %25 : vector<8x128xf32>
    %c0_19 = arith.constant 0 : index
    %c0_20 = arith.constant 0 : index
    %27 = vector.load %arg11[%c0_19, %c0_20] : memref<8x128xf32, #tpu.memory_space<vmem>>, vector<8x128xf32>
    tpu.vector_store %arg11[%c0_19, %c0_20], %19 {strides = array<i32>} : memref<8x128xf32, #tpu.memory_space<vmem>>, vector<8x128xf32>,
    %c0_21 = arith.constant 0 : index
    %c0_22 = arith.constant 0 : index
    %28 = vector.load %arg12[%c0_21, %c0_22] : memref<8x128xf32, #tpu.memory_space<vmem>>, vector<8x128xf32>
    tpu.vector_store %arg12[%c0_21, %c0_22], %26 {strides = array<i32>} : memref<8x128xf32, #tpu.memory_space<vmem>>, vector<8x128xf32>,
    %c0_23 = arith.constant 0 : index
    %c0_24 = arith.constant 0 : index
    %29 = vector.load %arg13[%c0_23, %c0_24] : memref<8x128xf32, #tpu.memory_space<vmem>>, vector<8x128xf32>
    %c0_25 = arith.constant 0 : index
    %c0_26 = arith.constant 0 : index
    %30 = vector.load %arg14[%c0_25, %c0_26] : memref<8x128xf32, #tpu.memory_space<vmem>>, vector<8x128xf32>
    %c0_27 = arith.constant 0 : index
    %c0_28 = arith.constant 0 : index
    %31 = vector.load %arg15[%c0_27, %c0_28] : memref<8x128xf32, #tpu.memory_space<vmem>>, vector<8x128xf32>
    %c0_29 = arith.constant 0 : index
    %c0_30 = arith.constant 0 : index
    %32 = vector.load %arg16[%c0_29, %c0_30] : memref<8x128xf32, #tpu.memory_space<vmem>>, vector<8x128xf32>
    %c0_i32_31 = arith.constant 0 : i32
    %33 = arith.addi %17, %c0_i32_31 : i32
    %34 = vector.broadcast %33 : i32 to vector<8x1xi32>
    %35 = arith.subi %15, %34 : vector<8x1xi32>
    %36 = vector.broadcast %16 : vector<1x128xi32> to vector<8x128xi32>
    %37 = vector.broadcast %35 : vector<8x1xi32> to vector<8x128xi32>
    %38 = arith.cmpi eq, %36, %37 : vector<8x128xi32>
    %cst_32 = arith.constant 0.000000e+00 : f32
    %39 = vector.broadcast %cst_32 : f32 to vector<8x128xf32>
    %40 = arith.select %38, %8, %39 : vector<8x128xi1>, vector<8x128xf32>
    %41 = arith.addf %29, %40 : vector<8x128xf32>
    %42 = arith.mulf %8, %14 : vector<8x128xf32>
    %43 = arith.addf %30, %42 : vector<8x128xf32>
    %44 = arith.mulf %8, %8 : vector<8x128xf32>
    %45 = arith.addf %31, %44 : vector<8x128xf32>
    %46 = arith.mulf %14, %14 : vector<8x128xf32>
    %47 = arith.addf %32, %46 : vector<8x128xf32>
    %c0_33 = arith.constant 0 : index
    %c0_34 = arith.constant 0 : index
    %48 = vector.load %arg13[%c0_33, %c0_34] : memref<8x128xf32, #tpu.memory_space<vmem>>, vector<8x128xf32>
    tpu.vector_store %arg13[%c0_33, %c0_34], %41 {strides = array<i32>} : memref<8x128xf32, #tpu.memory_space<vmem>>, vector<8x128xf32>,
    %c0_35 = arith.constant 0 : index
    %c0_36 = arith.constant 0 : index
    %49 = vector.load %arg14[%c0_35, %c0_36] : memref<8x128xf32, #tpu.memory_space<vmem>>, vector<8x128xf32>
    tpu.vector_store %arg14[%c0_35, %c0_36], %43 {strides = array<i32>} : memref<8x128xf32, #tpu.memory_space<vmem>>, vector<8x128xf32>,
    %c0_37 = arith.constant 0 : index
    %c0_38 = arith.constant 0 : index
    %50 = vector.load %arg15[%c0_37, %c0_38] : memref<8x128xf32, #tpu.memory_space<vmem>>, vector<8x128xf32>
    tpu.vector_store %arg15[%c0_37, %c0_38], %45 {strides = array<i32>} : memref<8x128xf32, #tpu.memory_space<vmem>>, vector<8x128xf32>,
    %c0_39 = arith.constant 0 : index
    %c0_40 = arith.constant 0 : index
    %51 = vector.load %arg16[%c0_39, %c0_40] : memref<8x128xf32, #tpu.memory_space<vmem>>, vector<8x128xf32>
    tpu.vector_store %arg16[%c0_39, %c0_40], %47 {strides = array<i32>} : memref<8x128xf32, #tpu.memory_space<vmem>>, vector<8x128xf32>,
    %c1_i32 = arith.constant 1 : i32
    %52 = arith.cmpi eq, %arg1, %c1_i32 : i32
    %53 = arith.extui %52 : i1 to i32
    %c0_i32_41 = arith.constant 0 : i32
    %54 = arith.cmpi ne, %53, %c0_i32_41 : i32
    scf.if %54 {
      %c0_42 = arith.constant 0 : index
      %c0_43 = arith.constant 0 : index
      %55 = vector.load %arg11[%c0_42, %c0_43] : memref<8x128xf32, #tpu.memory_space<vmem>>, vector<8x128xf32>
      %cst_44 = arith.constant dense<0xFF800000> : vector<8xf32>
      %56 = vector.multi_reduction <maximumf>, %55, %cst_44 [1] : vector<8x128xf32> to vector<8xf32>
      %57 = vector.shape_cast %56 : vector<8xf32> to vector<8x1xf32>
      %c0_45 = arith.constant 0 : index
      %c0_46 = arith.constant 0 : index
      %58 = vector.load %arg12[%c0_45, %c0_46] : memref<8x128xf32, #tpu.memory_space<vmem>>, vector<8x128xf32>
      %59 = vector.broadcast %57 : vector<8x1xf32> to vector<8x128xf32>
      %60 = arith.subf %55, %59 : vector<8x128xf32>
      %61 = math.exp %60 : vector<8x128xf32>
      %62 = arith.mulf %58, %61 : vector<8x128xf32>
      %cst_47 = arith.constant dense<0.000000e+00> : vector<8xf32>
      %63 = vector.multi_reduction <add>, %62, %cst_47 [1] : vector<8x128xf32> to vector<8xf32>
      %64 = vector.shape_cast %63 : vector<8xf32> to vector<8x1xf32>
      %65 = math.log %64 : vector<8x1xf32>
      %66 = arith.addf %57, %65 : vector<8x1xf32>
      %c0_48 = arith.constant 0 : index
      %c0_49 = arith.constant 0 : index
      %67 = vector.load %arg13[%c0_48, %c0_49] : memref<8x128xf32, #tpu.memory_space<vmem>>, vector<8x128xf32>
      %cst_50 = arith.constant dense<0.000000e+00> : vector<8xf32>
      %68 = vector.multi_reduction <add>, %67, %cst_50 [1] : vector<8x128xf32> to vector<8xf32>
      %69 = vector.shape_cast %68 : vector<8xf32> to vector<8x1xf32>
      %c-100_i32 = arith.constant -100 : i32
      %70 = vector.broadcast %c-100_i32 : i32 to vector<8x1xi32>
      %71 = arith.cmpi ne, %15, %70 : vector<8x1xi32>
      %72 = arith.subf %66, %69 : vector<8x1xf32>
      %cst_51 = arith.constant 0.000000e+00 : f32
      %73 = vector.broadcast %cst_51 : f32 to vector<8x1xf32>
      %74 = arith.select %71, %72, %73 : vector<8x1xi1>, vector<8x1xf32>
      %c0_52 = arith.constant 0 : index
      %c0_53 = arith.constant 0 : index
      %75 = vector.load %arg9[%c0_52, %c0_53] : memref<8x1xf32, #tpu.memory_space<vmem>>, vector<8x1xf32>
      tpu.vector_store %arg9[%c0_52, %c0_53], %74 {strides = array<i32>} : memref<8x1xf32, #tpu.memory_space<vmem>>, vector<8x1xf32>,
      %c8_i32 = arith.constant 8 : i32
      %76 = arith.muli %arg0, %c8_i32 : i32
      %77 = tpu.iota {dimensions = array<i32: 0>} : vector<8x1xi32>
      %78 = vector.broadcast %76 : i32 to vector<8x1xi32>
      %79 = arith.addi %78, %77 : vector<8x1xi32>
      %c14_i32 = arith.constant 14 : i32
      %80 = vector.broadcast %c14_i32 : i32 to vector<8x1xi32>
      %81 = arith.cmpi slt, %79, %80 : vector<8x1xi32>
      %c0_54 = arith.constant 0 : index
      %c0_55 = arith.constant 0 : index
      %82 = vector.load %arg14[%c0_54, %c0_55] : memref<8x128xf32, #tpu.memory_space<vmem>>, vector<8x128xf32>
      %cst_56 = arith.constant dense<0.000000e+00> : vector<8xf32>
      %83 = vector.multi_reduction <add>, %82, %cst_56 [1] : vector<8x128xf32> to vector<8xf32>
      %84 = vector.shape_cast %83 : vector<8xf32> to vector<8x1xf32>
      %c0_57 = arith.constant 0 : index
      %c0_58 = arith.constant 0 : index
      %85 = vector.load %arg15[%c0_57, %c0_58] : memref<8x128xf32, #tpu.memory_space<vmem>>, vector<8x128xf32>
      %cst_59 = arith.constant dense<0.000000e+00> : vector<8xf32>
      %86 = vector.multi_reduction <add>, %85, %cst_59 [1] : vector<8x128xf32> to vector<8xf32>
      %87 = vector.shape_cast %86 : vector<8xf32> to vector<8x1xf32>
      %c0_60 = arith.constant 0 : index
      %c0_61 = arith.constant 0 : index
      %88 = vector.load %arg16[%c0_60, %c0_61] : memref<8x128xf32, #tpu.memory_space<vmem>>, vector<8x128xf32>
      %cst_62 = arith.constant dense<0.000000e+00> : vector<8xf32>
      %89 = vector.multi_reduction <add>, %88, %cst_62 [1] : vector<8x128xf32> to vector<8xf32>
      %90 = vector.shape_cast %89 : vector<8xf32> to vector<8x1xf32>
      %cst_63 = arith.constant 1.000000e-24 : f32
      %91 = vector.broadcast %cst_63 : f32 to vector<8x1xf32>
      %92 = arith.maximumf %87, %91 : vector<8x1xf32>
      %93 = math.rsqrt %92 : vector<8x1xf32>
      %94 = arith.mulf %84, %93 : vector<8x1xf32>
      %cst_64 = arith.constant 1.000000e-24 : f32
      %95 = vector.broadcast %cst_64 : f32 to vector<8x1xf32>
      %96 = arith.maximumf %90, %95 : vector<8x1xf32>
      %97 = math.rsqrt %96 : vector<8x1xf32>
      %98 = arith.mulf %94, %97 : vector<8x1xf32>
      %cst_65 = arith.constant 1.000000e+00 : f32
      %99 = vector.broadcast %cst_65 : f32 to vector<8x1xf32>
      %100 = arith.subf %99, %98 : vector<8x1xf32>
      %cst_66 = arith.constant 5.000000e-01 : f32
      %101 = vector.broadcast %cst_66 : f32 to vector<8x1xf32>
      %102 = arith.mulf %101, %100 : vector<8x1xf32>
      %cst_67 = arith.constant 0.000000e+00 : f32
      %103 = vector.broadcast %cst_67 : f32 to vector<8x1xf32>
      %104 = arith.select %81, %102, %103 : vector<8x1xi1>, vector<8x1xf32>
      %c0_68 = arith.constant 0 : index
      %c0_69 = arith.constant 0 : index
      %105 = vector.load %arg10[%c0_68, %c0_69] : memref<8x1xf32, #tpu.memory_space<vmem>>, vector<8x1xf32>
      tpu.vector_store %arg10[%c0_68, %c0_69], %104 {strides = array<i32>} : memref<8x1xf32, #tpu.memory_space<vmem>>, vector<8x1xf32>,
    } else {
    }
    return
  }
  func.func @transform_0(%arg0: i32, %arg1: i32) -> (i32, i32) {
    %c0_i32 = arith.constant 0 : i32
    %c0_i32_0 = arith.constant 0 : i32
    return %arg0, %c0_i32 : i32, i32
  }
  func.func @transform_1(%arg0: i32, %arg1: i32) -> (i32, i32) {
    %c0_i32 = arith.constant 0 : i32
    %c0_i32_0 = arith.constant 0 : i32
    return %c0_i32, %arg1 : i32, i32
  }
  func.func @transform_2(%arg0: i32, %arg1: i32) -> (i32, i32) {
    %c0_i32 = arith.constant 0 : i32
    %c0_i32_0 = arith.constant 0 : i32
    return %arg0, %c0_i32 : i32, i32
  }
  func.func @transform_3(%arg0: i32, %arg1: i32) -> (i32, i32) {
    %c0_i32 = arith.constant 0 : i32
    %c0_i32_0 = arith.constant 0 : i32
    return %c0_i32, %arg1 : i32, i32
  }
  func.func @transform_4(%arg0: i32, %arg1: i32) -> (i32, i32) {
    %c0_i32 = arith.constant 0 : i32
    %c0_i32_0 = arith.constant 0 : i32
    return %arg0, %c0_i32 : i32, i32
  }
  func.func @transform_5(%arg0: i32, %arg1: i32) -> (i32, i32) {
    %c0_i32 = arith.constant 0 : i32
    %c0_i32_0 = arith.constant 0 : i32
    return %c0_i32, %arg1 : i32, i32
  }
  func.func @transform_6(%arg0: i32, %arg1: i32) -> (i32, i32) {
    %c0_i32 = arith.constant 0 : i32
    %c0_i32_0 = arith.constant 0 : i32
    return %c0_i32, %arg1 : i32, i32
  }
  func.func @transform_7(%arg0: i32, %arg1: i32) -> (i32, i32) {
    %c0_i32 = arith.constant 0 : i32
    %c0_i32_0 = arith.constant 0 : i32
    return %arg0, %c0_i32 : i32, i32
  }
  func.func @transform_8(%arg0: i32, %arg1: i32) -> (i32, i32) {
    %c0_i32 = arith.constant 0 : i32
    %c0_i32_0 = arith.constant 0 : i32
    return %arg0, %c0_i32 : i32, i32
  }
}

</mosaic_0001>

<bundles_post_ra>
// kernel: tpu_custom_call.1
= control target key start
LH: loop header
LB: loop body
LE: loop exit
PB: predicated region body
PF: predicated region fallthrough
CT: control target
= control target key end

     0   :  { %s1667_s0 = inlined_call_operand.vmem [shape: f32[16,32], index: 0, kind: input, shape index: {}]   ;;  %s1668_s1 = inlined_call_operand.hbm [shape: f32[32,256], index: 1, kind: input, shape index: {}]   ;;  %s1669_s2 = inlined_call_operand.hbm [shape: f32[16,32], index: 2, kind: input, shape index: {}]   ;;  %s1670_s3 = inlined_call_operand.hbm [shape: f32[32,256], index: 3, kind: input, shape index: {}]   ;;  %s1671_s4 = inlined_call_operand.vmem [shape: s32[16,1], index: 4, kind: input, shape index: {}]   ;;  %s1672_s5 = inlined_call_operand.vmem [shape: f32[1,256], index: 5, kind: input, shape index: {}]   ;;  %s1673_s6 = inlined_call_operand.vmem [shape: f32[1,256], index: 6, kind: input, shape index: {}]   ;;  %s1674_s7 = inlined_call_operand.vmem [shape: f32[16,1], index: 7, kind: output, shape index: {0}]   ;;  %s1675_s8 = inlined_call_operand.vmem [shape: f32[16,1], index: 8, kind: output, shape index: {1}]  }
   0x1   :  { %1683 = sst [smem:[#allocation24_spill]] %s1668_s1 }
   0x2   :  { %1684 = sst [smem:[#allocation25_spill]] %s1669_s2 }
   0x3   :  { %1685 = sst [smem:[#allocation26_spill]] %s1670_s3 }
   0x4   :  { %1686 = sst [smem:[#allocation27_spill]] %s1673_s6 }
   0x5   :  { %1687 = sst [smem:[#allocation28_spill]] %s1674_s7 }
   0x6   :  { %1688 = sst [smem:[#allocation29_spill]] %s1675_s8 }
   0x7   :  { %14 = vsyncpa [#allocation9], 0 }
   0x8   :  { %16 = vsyncpa [#allocation9 + $0x1], 0 }
   0x9   :  { %17 = vsyncpa [#allocation11], 0 }
   0xa   :  { %19 = vsyncpa [#allocation11 + $0x1], 0  ;;  %s1369_s27 = smov 0   ;;  %s1371_s28 = smov 0  }
   0xb   :  { %s1373_s29 = smov 0   ;;  %s1375_s30 = smov 0  }
   0xc   :  { %s1377_s9 = smov 0   ;;  %s1379_s10 = smov 0  }
   0xd   :  { %s1381_s11 = smov 0   ;;  %s1383_s12 = smov 0  }
   0xe   :  { %s1385_s13 = smov 0   ;;  %s1387_s14 = smov 0  }
   0xf   :  { %s1389_s15 = smov 0  }
  0x10 LB: > { %1689 = sst [smem:[#allocation16_spill]] %s1279_s29  ;;  %s1676_s16 = sadd.s32 4294967295, %s1311_s15   ;;  %s1311_s15 = sphi %s1389_s15, %s25_s15   ;;  %s1307_s14 = sphi %s1387_s14, %s1722_s14   ;;  %s1303_s13 = sphi %s1385_s13, %s1721_s13   ;;  %s1299_s12 = sphi %s1383_s12, %s1720_s12   ;;  %s1295_s11 = sphi %s1381_s11, %s1719_s11   ;;  %s1291_s10 = sphi %s1379_s10, %s1718_s10   ;;  %s1287_s9 = sphi %s1377_s9, %s1726_s9   ;;  %s1283_s30 = sphi %s1375_s30, %s1725_s30   ;;  %s1279_s29 = sphi %s1373_s29, %s1716_s29   ;;  %s1275_s28 = sphi %s1371_s28, %s1724_s28   ;;  %s1271_s27 = sphi %s1369_s27, %s1723_s27  }
  0x11   : > { %1690 = sst [smem:[#allocation17_spill]] %s1291_s10  ;;  %s34_s17 = sadd.s32 1, %s1303_s13 }
  0x12   : > { %1691 = sst [smem:[#allocation18_spill]] %s1303_s13  ;;  %p35_p0 = scmp.ge.s32.totalorder %s34_s17, 2 }
  0x13   : > { %1692 = sst [smem:[#allocation19_spill]] %s1307_s14  ;;  %s37_s18 = sadd.s32 1, %s1307_s14 }
  0x14   : > { %s70_s19 = sadd.s32 1, %s1291_s10  ;;  %p77_p1 = scmp.ne.s32.totalorder %s1291_s10, %s1287_s9 }
  0x15   : > { %s1728_s17 = smov (%p35_p0, %s34_s17), 0  ;;  %s1730_s18 = smov (!%p35_p0, %s37_s18), %s1307_s14 }
  0x16   : > { %1693 = sst [smem:[#allocation20_spill]] %s1728_s17  ;;  %s67_s20 = ssub.s32 %s1303_s13, %s1728_s17 }
  0x17   : > { %p78_p2 = scmp.eq.s32.totalorder %s1311_s15, 0  ;;  %p39_p3 = scmp.ge.s32.totalorder %s1730_s18, 2 }
  0x18   : > { %p68_p4 = scmp.eq.s32.totalorder %s67_s20, 0  ;;  %p83_p6 = scmp.ne.s32.totalorder %s1287_s9, %s1283_s30 }
  0x19   : > { %p1436_p5 = por %p78_p2, %p77_p1  ;;  %s1732_s18 = smov (%p39_p3, %s1730_s18), 0 }
  0x1a   : > { %1695 = sst [smem:[#allocation21_spill]] %s1732_s18  ;;  %p84_p7 = scmp.eq.s32.totalorder %s1676_s16, 0 }
  0x1b   : > { %s1444_s22 = scalar_select %p68_p4, %s1291_s10, %s70_s19  }
  0x1c   : > { %s93_s23 = ssub.s32 %s1307_s14, %s1732_s18  ;;  %s96_s24 = sadd.s32 1, %s1279_s29 }
  0x1d   : > { %1696 = sst [smem:[#allocation22_spill]] %s1444_s22  ;;  %p94_p8 = scmp.eq.s32.totalorder %s93_s23, 0 }
  0x1e   : > { %p1451_p9 = por %p84_p7, %p83_p6  ;;  %p103_p10 = scmp.ne.s32.totalorder %s1279_s29, %s1275_s28 }
  0x1f   : > { %s1458_s26 = scalar_select %p94_p8, %s1279_s29, %s96_s24  }
  0x20   : > { %p105_p11 = por %p103_p10, %p78_p2  ;;  %p109_p12 = scmp.ne.s32.totalorder %s1275_s28, %s1271_s27 }
  0x21   : > { %1698 = sst [smem:[#allocation23_spill]] %s1458_s26  ;;  %p1019_p13 = scmp.lt.s32.totalorder %s1311_s15, 4 }
  0x22   : > { %p1465_p0 = por %p109_p12, %p84_p7  ;;  %s316_s19 = sand.u32 1, %s1311_s15  }
  0x23   : > { %p1472_p1 = pnand %p1019_p13, %p1436_p5  ;;  %s318_s23 = sand.u32 1, %s1279_s29  }
  0x24   : > { %s950_s16 = sshll.u32 %s1307_s14, 7  ;;  %s949_s18 = sshll.u32 %s318_s23, 3 }
  0x25   : > { %s1701_s2 = sld [smem:[#allocation25_spill]]  ;;  %s320_s26 = scalar_lea.vmem [#allocation10], %s949_s18 }
  0x26   : > { %s327_s27 = sshll.u32 %s320_s26, 4  ;;  %p1481_p2 = pnand %p1019_p13, %p105_p11  ;;  %s328_s27 = int_to_ptr.vmem [resolvable:$true] %s327_s27 }
  0x27   : > { %p953_p3 = scmp.ge.s32.totalorder %s1311_s15, 1  ;;  %p371_p4 = scmp.lt.s32.totalorder %s1311_s15, 5 }
  0x28   : > { %s1487_s21 = scalar_lea.sflag [#allocation11], %s316_s19  ;;  %p1131_p5 = pneg %p1481_p2 }
  0x29   : > { %s1142_s14 = scalar_lea.vmem %s328_s27, 128  ;;  %s1313_s17 = smov [#allocation10]  }
  0x2a   : > { %p1143_p6 = scmp.ne.s32.totalorder %s328_s27, %s1142_s14 }
  0x2b   : > { %s325_s22 = scalar_lea.hbm %s1701_s2, %s950_s16  ;;  %s1147_s16 = sshll.u32 %s1313_s17, 4  ;;  %s1148_s16 = int_to_ptr.vmem [resolvable:$false] %s1147_s16 }
  0x2c   : > { %p1145_p7 = pnand %p1143_p6, %p1131_p5  ;;  %s1149_s18 = scalar_lea.vmem %s1148_s16, 256 }
  0x2d   : > { %p1150_p10 = scmp.lt.s32.totalorder %s328_s27, %s1148_s16  ;;  %p1151_p11 = scmp.lt.s32.totalorder %s1149_s18, %s1142_s14 }
  0x2e   : > { %p1146_p8 = pneg %p1145_p7 }
  0x2f   : > { %p1152_p12 = por %p1151_p11, %p1150_p10 }
  0x31   : > { %p1153_p13 = pnand %p1152_p12, %p1146_p8 }
  0x33   : > { %1156 = shalt.err (!%p1153_p13)
}
  0x34   : > { %1015 = dma.hbm_to_vmem [thread:$0]  (!%p1481_p2), %s325_s22, 128, %s328_s27, %s1487_s21  }
  0x35   : > { %p1498_p5 = pnand %p953_p3, %p371_p4  ;;  %s296_s14 = sand.u32 1, %s1291_s10  }
  0x36   : > { %s1503_s19 = sshll.u32 %s296_s14, 5  ;;  %s948_s23 = sshll.u32 %s1303_s13, 7 }
  0x37   : > { %s1704_s1 = sld [smem:[#allocation24_spill]]  ;;  %s300_s16 = scalar_lea.vmem [#allocation8], %s1503_s19 }
  0x38   : > { %s306_s18 = sshll.u32 %s300_s16, 4  ;;  %s297_s2 = scalar_lea.sflag [#allocation9], %s296_s14  ;;  %s307_s18 = int_to_ptr.vmem [resolvable:$true] %s306_s18 }
  0x39   : > { %p1159_p2 = pneg %p1472_p1  ;;  %s1170_s22 = scalar_lea.vmem %s307_s18, 512 }
  0x3a   : > { %p1171_p3 = scmp.ne.s32.totalorder %s307_s18, %s1170_s22  ;;  %s1314_s27 = smov [#allocation8]  }
  0x3b   : > { %s1175_s10 = sshll.u32 %s1314_s27, 4  ;;  %s1176_s10 = int_to_ptr.vmem [resolvable:$false] %s1175_s10 }
  0x3c   : > { %p1173_p4 = pnand %p1171_p3, %p1159_p2  ;;  %s1177_s13 = scalar_lea.vmem %s1176_s10, 1024 }
  0x3d   : > { %s305_s17 = scalar_lea.hbm %s1704_s1, %s948_s23  ;;  %p1178_p7 = scmp.lt.s32.totalorder %s307_s18, %s1176_s10 }
  0x3e   : > { %p1174_p6 = pneg %p1173_p4  ;;  %p1179_p8 = scmp.lt.s32.totalorder %s1177_s13, %s1170_s22 }
  0x40   : > { %p1180_p10 = por %p1179_p8, %p1178_p7 }
  0x42   : > { %p1181_p11 = pnand %p1180_p10, %p1174_p6 }
  0x44   : > { %1184 = shalt.err (!%p1181_p11)
}
  0x45   : > { %s1315_s8 = smov 256   ;;  %s1316_s14 = smov 128  }
  0x46   : > { %s1317_s24 = smov 8   ;;  %s1705_s3 = sld [smem:[#allocation26_spill]] }
  0x47   : > { %1012 = dma.hbm_to_vmem [thread:$0]  (!%p1472_p1), %s305_s17, 512, %s307_s18, %s297_s2, %s1315_s8, %s1316_s14, %s1317_s24  }
  0x48   : > { %s338_s27 = scalar_lea.vmem [#allocation12], %s1503_s19  ;;  %s1318_s13 = smov [#allocation12]  }
  0x49   : > { %s344_s7 = sshll.u32 %s338_s27, 4  ;;  %s1203_s22 = sshll.u32 %s1318_s13, 4  ;;  %s345_s7 = int_to_ptr.vmem [resolvable:$true] %s344_s7  ;;  %s1204_s22 = int_to_ptr.vmem [resolvable:$false] %s1203_s22 }
  0x4a   : > { %s1198_s10 = scalar_lea.vmem %s345_s7, 512  ;;  %s1205_s6 = scalar_lea.vmem %s1204_s22, 1024 }
  0x4b   : > { %p1199_p12 = scmp.ne.s32.totalorder %s345_s7, %s1198_s10  ;;  %p1206_p4 = scmp.lt.s32.totalorder %s345_s7, %s1204_s22 }
  0x4c   : > { %s343_s29 = scalar_lea.hbm %s1705_s3, %s948_s23  ;;  %p1207_p6 = scmp.lt.s32.totalorder %s1205_s6, %s1198_s10 }
  0x4d   : > { %p1201_p13 = pnand %p1199_p12, %p1159_p2 }
  0x4e   : > { %p1208_p7 = por %p1207_p6, %p1206_p4 }
  0x4f   : > { %p1202_p3 = pneg %p1201_p13 }
  0x51   : > { %p1209_p8 = pnand %p1208_p7, %p1202_p3 }
  0x53   : > { %1212 = shalt.err (!%p1209_p8)
}
  0x54   : > { %1018 = dma.hbm_to_vmem [thread:$0]  (!%p1472_p1), %s343_s29, 512, %s345_s7, %s1487_s21, %s1315_s8, %s1316_s14, %s1317_s24  }
  0x55   : > { %375 = sbr.rel (%p1498_p5) target bundleno = 663 (0x297), region = 48  ;;  %s377_s1 = sand.u32 (!%p1498_p5), 1, %s1287_s9  }
  0x56   : > { %s954_s2 = sshll.u32 (!%p1498_p5), %s377_s1, 5  ;;  %s378_s19 = scalar_lea.sflag (!%p1498_p5), [#allocation9], %s377_s1 }
  0x57   : > { %s1530_s23 = scalar_lea.vmem (!%p1498_p5), [#allocation8], %s954_s2 }
  0x5a   : > { %1258 = dma.done.wait (%p1451_p9), %s378_s19, 512  }
  0x5b   : > { %1260 = vsyncadd (%p1451_p9), %s378_s19, 4294966784  ;;  %s1706_s6 = sadd.s32 4294967295, %s1311_s15   ;;  %s388_s29 = sand.u32 1, %s1275_s28  }
  0x5c   : > { %s386_s7 = sand.u32 1, %s1706_s6   ;;  %s1539_s20 = sshll.u32 %s388_s29, 3 }
  0x5d   : > { %s387_s21 = scalar_lea.sflag [#allocation11], %s386_s7 }
  0x5e   : > { %1262 = dma.done.wait (%p1465_p0), %s387_s21, 128  }
  0x5f   : > { %1264 = vsyncadd (%p1465_p0), %s387_s21, 4294967168  ;;  %s1546_s17 = scalar_lea.vmem [#allocation12], %s954_s2 }
  0x60   : > { %1266 = dma.done.wait (%p1451_p9), %s387_s21, 512  }
  0x61   : > { %1268 = vsyncadd (%p1451_p9), %s387_s21, 4294966784  ;;  %p459_p1 = scmp.lt.s32.totalorder %s1299_s12, 1  ;;  %p467_p5 = scmp.lt.s32.totalorder %s1295_s11, 1 }
  0x62   : > { %s1707_s6 = sld [smem:[#allocation27_spill]]  ;;  %p961_p9 = scmp.ne.s32.totalorder %s1295_s11, 0 }
  0x63   : > { %s460_s18 = scalar_select %p459_p1, %s1299_s12, 1 }
  0x64   : > { %s1556_s8 = scalar_select %p467_p5, %s1295_s11, 1 }
  0x65   : > { %s1558_s30 = sshll.u32 %s460_s18, 3  ;;  %s1708_s18 = sld [smem:[#allocation28_spill]] }
  0x66   : > { %s466_s10 = scalar_lea.vmem %s1671_s4, %s1558_s30  ;;  %s469_s1 = scalar_lea.vmem %s1672_s5, %s1556_s8 }
  0x67   : > { %s1709_s3 = sld [smem:[#allocation29_spill]] }
  0x68   : > { %s472_s7 = scalar_lea.vmem %s1707_s6, %s1556_s8 }
  0x69   : > { %484 = sbr.rel (%p961_p9) target bundleno = 114 (0x72), region = 64 }
  0x6b   : > { %s476_s14 = scalar_lea.vmem %s1708_s18, %s1558_s30 }
  0x6d   : > { %s480_s25 = scalar_lea.vmem %s1709_s3, %s1558_s30 }
  0x6e   : > { %v1319_v0 = vmov -inf   ;;  %v1320_v1 = vmov 0.0  }
  0x6f   : > { %485 = vst [vmem:[#allocation2] sm:$0xff] %v1319_v0  ;;  %486 = vst [vmem:[#allocation3] sm:$0xff] %v1320_v1 }
  0x70   : > { %487 = vst [vmem:[#allocation4] sm:$0xff] %v1320_v1  ;;  %488 = vst [vmem:[#allocation5] sm:$0xff] %v1320_v1 }
  0x71   : > { %489 = vst [vmem:[#allocation6] sm:$0xff] %v1320_v1  ;;  %490 = vst [vmem:[#allocation7] sm:$0xff] %v1320_v1 }
  0x72 PF: > { %v495_v2 = vld [vmem:[%s1530_s23 + $0x18] sm:$0xff]  ;;  %v581_v3 = vld [vmem:[%s1546_s17 + $0x18] sm:$0xff]  ;;  %v1321_v4 = vmov 0.0   ;;  %v494_v5 = vld [vmem:[%s1530_s23 + $0x10] sm:$0xff]  ;;  %s966_s3 = sshll.u32 %s1295_s11, 7  ;;  %s1710_s22 = scalar_lea.vmem %s1667_s0, %s1558_s30  ;;  %vm503_vm0 = vcmask 261120   ;;  %v663_v17 = vlaneseq }
  0x73   : > { %981 = vmatprep.subr.mxu0 %v1321_v4  ;;  %992 = vmatprep.subr.mxu1 %v1321_v4  ;;  %v580_v6 = vld [vmem:[%s1546_s17 + $0x10] sm:$0xff]  ;;  %v493_v7 = vld [vmem:[%s1530_s23 + $0x8] sm:$0xff]  ;;  %v579_v8 = vld [vmem:[%s1546_s17 + $0x8] sm:$0xff]  ;;  %v683_v11 = vstv %s966_s3  ;;  %vm1322_vm1 = vmmov 0   ;;  %v1323_v16 = vmov 0   ;;  %p967_p0 = scmp.ne.s32.totalorder %s1295_s11, 1 }
  0x74   : > { %982 = vmatpush3.msra.mxu0 %v495_v2  ;;  %993 = vmatpush3.msra.mxu1 %v581_v3  ;;  %v492_v9 = vld [vmem:[%s1530_s23] sm:$0xff]  ;;  %v1598_v10 = vld [vmem:[%s466_s10] sm:$0xff]  ;;  %s1711_s23 = scalar_lea.vmem [#allocation10], %s1539_s20  ;;  %v664_v18 = vand.u32 127, %v663_v17  ;;  %s968_s11 = sshll.u32 (!%p967_p0), %s1299_s12, 3 }
  0x75   : > { %983 = vmatprep.subr.mxu0 %v1321_v4  ;;  %994 = vmatprep.subr.mxu1 %v1321_v4  ;;  %v578_v12 = vld [vmem:[%s1546_s17] sm:$0xff]  ;;  %v577_v14 = vld [vmem:[%s1711_s23] sm:$0xff]  ;;  %v684_v15 = vsub.s32 %v1598_v10, %v683_v11 }
  0x76   : > { %984 = vmatpush3.msra.mxu0 %v494_v5  ;;  %995 = vmatpush3.msra.mxu1 %v580_v6  ;;  %v491_v13 = vld [vmem:[%s1710_s22] sm:$0xff]  ;;  %v668_v46 = vld [vmem:[#allocation3] sm:$0xff] }
  0x77   : > { %985 = vmatprep.subr.mxu0 %v1321_v4  ;;  %996 = vmatprep.subr.mxu1 %v1321_v4  ;;  %v962_v19 = vld [vmem:[%s469_s1] ss:$0 sm:$0xff]  ;;  %v680_v28 = vld [vmem:[#allocation5] sm:$0xff]  ;;  %v679_v36 = vld [vmem:[#allocation4] sm:$0xff] }
  0x78   : > { %986 = vmatpush3.msra.mxu0 %v493_v7  ;;  %997 = vmatpush3.msra.mxu1 %v579_v8  ;;  %v964_v20 = vld [vmem:[%s472_s7] ss:$0 sm:$0xff]  ;;  %v682_v33 = vld [vmem:[#allocation7] sm:$0xff] }
  0x79   : > { %987 = vmatprep.subr.mxu0 %v1321_v4  ;;  %998 = vmatprep.subr.mxu1 %v1321_v4  ;;  %v666_v23 = vld [vmem:[#allocation2] sm:$0xff] }
  0x7a   : > { %988 = vmatpush3.msra.mxu0 %v492_v9  ;;  %989 = vmatprep.mubr.msk.f32.mxu0 %vm1322_vm1, %v1321_v4  ;;  %v681_v27 = vld [vmem:[#allocation6] sm:$0xff] }
  0x7b   : > { %999 = vmatpush3.msra.mxu1 %v578_v12  ;;  %1000 = vmatprep.mubr.msk.f32.mxu1 %vm1322_vm1, %v1321_v4 }
  0x7c   : > { %990 = vmatmul.mubr.msk.f32.vlgmr.msra.gmra.mxu0 %vm503_vm0, %v491_v13  ;;  %1001 = vmatmul.mubr.msk.f32.vlgmr.msra.gmra.mxu1 %vm503_vm0, %v577_v14 }
  0x7d   : > { %1116 = vset.pattern.permute.xlu0 %v1323_v16 }
  0x7e   : > { %686 = vperm.xlu0 %1116, %v684_v15  }
  0xf9   : > { %v687_v21 = vpop.permute.xlu0 %686 }
  0xfa   : > { %vm688_vm2 = vcmp.eq.s32.totalorder %v664_v18, %v687_v21 }
 0x13c   : > { %v573_v22 = vpop.f32.mrf.mxu0  ;;  %v658_v24 = vpop.f32.mrf.mxu1 }
 0x13d   : > { %v574_v25 = vadd.f32 %v962_v19, %v573_v22  ;;  %v659_v26 = vadd.f32 %v964_v20, %v658_v24 }
 0x13e   : > { %v991_v29 = vpop.f32.mrf.mxu0  ;;  %v1002_v30 = vpop.f32.mrf.mxu1 }
 0x13f   : > { %v667_v31 = vmax.f32 %v666_v23, %v574_v25  ;;  %v693_v32 = vmul.f32 %v574_v25, %v574_v25  ;;  %v691_v34 = vmul.f32 %v659_v26, %v574_v25  ;;  %v695_v35 = vmul.f32 %v659_v26, %v659_v26 }
 0x140   : > { %v689_v37 = vsel %vm688_vm2, %v574_v25, 0.0 }
 0x141   : > { %v669_v38 = vsub.f32 %v666_v23, %v667_v31  ;;  %v673_v39 = vsub.f32 %v574_v25, %v667_v31  ;;  %677 = vst [vmem:[#allocation2] sm:$0xff] %v667_v31  ;;  %v694_v40 = vadd.f32 %v693_v32, %v681_v27  ;;  %v692_v41 = vadd.f32 %v691_v34, %v680_v28 }
 0x142   : > { %v696_v42 = vadd.f32 %v695_v35, %v682_v33  ;;  %v690_v43 = vadd.f32 %v689_v37, %v679_v36 }
 0x143   : > { %v670_v44 = vmul.f32 1.442695, %v669_v38  ;;  %v674_v45 = vmul.f32 1.442695, %v673_v39  ;;  %699 = vst [vmem:[#allocation6] sm:$0xff] %v694_v40  ;;  %698 = vst [vmem:[#allocation5] sm:$0xff] %v692_v41 }
 0x144   : > { %700 = vst [vmem:[#allocation7] sm:$0xff] %v696_v42  ;;  %697 = vst [vmem:[#allocation4] sm:$0xff] %v690_v43 }
 0x145   : > { %1117 = vpow2.f32 %v670_v44 }
 0x146   : > { %1119 = vpow2.f32 %v674_v45 }
 0x152   : > { %v1118_v47 = vpop.eup %1117 }
 0x153   : > { %v672_v48 = vmul.f32 %v1118_v47, %v668_v46  ;;  %v1120_v49 = vpop.eup %1119  ;;  %704 = sbr.rel (%p967_p0) target bundleno = 663 (0x297), region = 68 }
 0x155   : > { %v676_v50 = vadd.f32 %v1120_v49, %v672_v48 }
 0x157   : > { %678 = vst [vmem:[#allocation3] sm:$0xff] %v676_v50 }
 0x158   : > { %v705_v51 = vld [vmem:[#allocation2] sm:$0xff]  ;;  %v738_v53 = vld [vmem:[#allocation7] sm:$0xff]  ;;  %v732_v54 = vld [vmem:[#allocation5] sm:$0xff]  ;;  %v728_v7 = vshrl.u32 %v663_v17, 7  ;;  %v729_v8 = vstv %s968_s11  ;;  %vm724_vm3 = vcmask 7168   ;;  %vm721_vm5 = vcmp.ne.s32.totalorder %v1598_v10, 4294967196 }
 0x159   : > { %706 = vmax.xlane.f32.xlu0 %v705_v51  ;;  %v735_v52 = vld [vmem:[#allocation6] sm:$0xff]  ;;  %739 = vadd.xlane.f32.xlu1 %v738_v53  ;;  %v718_v0 = vld [vmem:[#allocation4] sm:$0xff] }
 0x15a   : > { %v730_v11 = vadd.s32 %v729_v8, %v728_v7 }
 0x15c   : > { %vm731_vm4 = vcmp.lt.s32.totalorder %v730_v11, 14 }
 0x15d   : > { %736 = vadd.xlane.f32.xlu0 %v735_v52 }
 0x15e   : > { %v708_v58 = vld [vmem:[#allocation3] sm:$0xff] }
 0x161   : > { %733 = vadd.xlane.f32.xlu0 %v732_v54 }
 0x1e2   : > { %v707_v55 = vpop.xlane.xlu0 %706  ;;  %v740_v62 = vpop.xlane.xlu1 %739 }
 0x1e3   : > { %v709_v56 = vsub.f32 %v705_v51, %v707_v55  ;;  %v744_v1 = vmax.f32 %v740_v62, 1e-24 }
 0x1e5   : > { %v710_v57 = vmul.f32 1.442695, %v709_v56 }
 0x1e6   : > { %v737_v60 = vpop.xlane.xlu0 %736 }
 0x1e7   : > { %1121 = vpow2.f32 %v710_v57  ;;  %v741_v63 = vmax.f32 %v737_v60, 1e-24 }
 0x1e9   : > { %1123 = vrsqrt.f32 %v741_v63 }
 0x1ea   : > { %1125 = vrsqrt.f32 %v744_v1  ;;  %v734_v4 = vpop.xlane.xlu0 %733 }
 0x1f4   : > { %v1122_v59 = vpop.eup %1121 }
 0x1f5   : > { %v712_v61 = vmul.f32 %v1122_v59, %v708_v58 }
 0x1f6   : > { %v1124_v2 = vpop.eup %1123 }
 0x1f7   : > { %713 = vadd.xlane.f32.xlu1 %v712_v61  ;;  %v1126_v3 = vpop.eup %1125  ;;  %v743_v5 = vmul.f32 %v1124_v2, %v734_v4 }
 0x1f9   : > { %v746_v6 = vmul.f32 %v1126_v3, %v743_v5 }
 0x1fb   : > { %719 = vadd.xlane.f32.xlu1 %v718_v0  ;;  %v747_v9 = vsub.f32 1.0, %v746_v6 }
 0x1fd   : > { %v748_v12 = vmul.f32 0.5, %v747_v9 }
 0x1ff   : > { %v749_v13 = vsel %vm731_vm4, %v748_v12, 0.0 }
 0x200   : > { %750 = vst.msk [vmem:[%s480_s25] sm:$0xff] %vm724_vm3, %v749_v13 }
 0x280   : > { %v714_v14 = vpop.xlane.xlu1 %713 }
 0x281   : > { %1127 = vlog2.f32 %v714_v14 }
 0x284   : > { %v720_v18 = vpop.xlane.xlu1 %719 }
 0x28e   : > { %v1128_v15 = vpop.eup %1127 }
 0x28f   : > { %v716_v16 = vmul.f32 0.6931472, %v1128_v15 }
 0x291   : > { %v717_v19 = vadd.f32 %v716_v16, %v707_v55 }
 0x293   : > { %v722_v17 = vsub.f32 %v717_v19, %v720_v18 }
 0x295   : > { %v723_v20 = vsel %vm721_vm5, %v722_v17, 0.0 }
 0x296   : > { %725 = vst.msk [vmem:[%s476_s14] sm:$0xff] %vm724_vm3, %v723_v20 }
 0x297 PF: > { %s25_s15 = sadd.s32 1, %s1311_s15   ;;  %s1715_s25 = sld [smem:[#allocation16_spill]] }
 0x298   : > { %p22_p2 = scmp.ge.s32.totalorder %s25_s15, 6   ;;  %s1716_s29 = sld [smem:[#allocation23_spill]] }
 0x299   : > { %s1717_s21 = sld [smem:[#allocation17_spill]]  ;;  %s1723_s27 = smov %s1275_s28 }
 0x29a   : > { %s1718_s10 = sld [smem:[#allocation22_spill]]  ;;  %s1725_s30 = smov %s1287_s9 }
 0x29b   : > { %s1719_s11 = sld [smem:[#allocation18_spill]]  ;;  %24 = sbr.rel (!%p22_p2) target bundleno = 16 (0x10), region = 144 }
 0x29c   : > { %s1720_s12 = sld [smem:[#allocation19_spill]] }
 0x29d   : > { %s1721_s13 = sld [smem:[#allocation20_spill]]  ;;  %s1724_s28 = smov %s1715_s25 }
 0x29e   : > { %s1722_s14 = sld [smem:[#allocation21_spill]] }
 0x29f   : > { %s1726_s9 = smov %s1717_s21 }
 0x2a0   :  { %784 = vsyncpa [#allocation9], 1 }
 0x2a1   :  { %786 = vsyncpa [#allocation9 + $0x1], 1 }
 0x2a2   :  { %787 = vsyncpa [#allocation11], 1 }
 0x2a3   :  { %789 = vsyncpa [#allocation11 + $0x1], 1 }

</bundles_post_ra>
